<compile_context>
chip_gen: v7x
topology: tpu7x:2x2x1
jax: 0.10.0
libtpu: 0.0.40
codegen_flags: <defaults>
</compile_context>

<pallas_src>
import jax
import jax.numpy as jnp
from jax import lax
from jax.experimental import pallas as pl
from jax.experimental.pallas import tpu as pltpu


def _default_act_dtype():
    """bf16 tanh on bf16-native EUP chips (v6e/v7x); f32 on v5e and older."""
    try:
        kind = jax.devices()[0].device_kind.lower()
    except Exception:
        return jnp.float32
    if any(old in kind for old in ("v2", "v3", "v4", "v5")):
        return jnp.float32
    return jnp.bfloat16


def _vmem_cap_bytes():
    """Scoped-VMEM cap: ~3/4 of physical VMEM (128 MiB v5e/v6e, 64 MiB v7x)."""
    try:
        phys = int(pltpu.get_tpu_info().vmem_capacity_bytes)
    except Exception:
        phys = 0
    if phys <= 0:
        phys = 64 * 1024 * 1024  # conservative fallback: assume the smallest (v7x)
    return (3 * phys) // 4


def _make_kernel(act_dtype):
    def kernel(x_ref, w1_ref, b1_ref, w2_ref, b2_ref, w3t_ref, b3_ref, o_ref):
        # fc1 -> tanh: bf16 MXU matmul, f32 accumulation, f32 bias add,
        # tanh in act_dtype (bf16 on v6e/v7x, f32 on v5e).
        z1 = (jnp.dot(x_ref[...], w1_ref[...], preferred_element_type=jnp.float32)
              + b1_ref[...])
        h1 = jnp.tanh(z1.astype(act_dtype)).astype(jnp.bfloat16)
        # fc2 -> tanh
        z2 = (jnp.dot(h1, w2_ref[...], preferred_element_type=jnp.float32)
              + b2_ref[...])
        h2 = jnp.tanh(z2.astype(act_dtype)).astype(jnp.bfloat16)
        # fc3: contract W3^T (8, Hp) with h2 (tile_b, Hp) on their last dims
        # (q @ k^T pattern) -> (8, tile_b); only row 0 is real, rows 1..7 of
        # w3t are zero padding.  Store one lane-dense f32 row per tile.
        s = lax.dot_general(
            w3t_ref[...], h2,
            dimension_numbers=(((1,), (1,)), ((), ())),
            preferred_element_type=jnp.float32)
        o_ref[...] = (s[:1, :] + b3_ref[...]).astype(o_ref.dtype)

    return kernel


def value_network_forward(x, params, *, tile_b=None, act_dtype=None):
    """Fused 3-layer MLP forward. Returns (B, 1) f32 values."""
    w1, b1, w2, b2, w3, b3 = params
    B, input_dim = x.shape
    hidden_dim = w1.shape[1]
    hidden_p = max(128, ((hidden_dim + 127) // 128) * 128)  # lane-dense activations

    if act_dtype is None:
        act_dtype = _default_act_dtype()

    # Batch tile: one grid step for small batches (the per-step work is a handful
    # of vmatmuls, so extra steps are pure overhead); multi-step only with >= 128
    # rows per step, which keeps the (1, tile_b) output block lane-aligned and the
    # bf16 x tile sublane-packed (128 % 16 == 0).
    if tile_b is None:
        if B <= 512:
            tile_b = B
        else:
            tile_b = next((t for t in (1024, 512, 256, 128) if B % t == 0), B)
    assert tile_b == B or (tile_b % 128 == 0 and B % tile_b == 0), (
        "tile_b must equal B (single grid step) or be a multiple of 128 dividing B")
    grid = (B // tile_b,)

    f32, bf16 = jnp.float32, jnp.bfloat16

    # bf16 storage for matmul operands; biases / output stay f32.
    x_bf = x.astype(bf16)
    # Zero-pad hidden to hidden_p.  Padded b1/b2 entries are exactly zero so
    # tanh(0 + 0) = 0 and padded activations contribute nothing downstream.
    w1_p = jnp.zeros((input_dim, hidden_p), bf16).at[:, :hidden_dim].set(w1.astype(bf16))
    b1_p = jnp.zeros((1, hidden_p), f32).at[:, :hidden_dim].set(b1.astype(f32))
    w2_p = jnp.zeros((hidden_p, hidden_p), bf16).at[:hidden_dim, :hidden_dim].set(w2.astype(bf16))
    b2_p = jnp.zeros((1, hidden_p), f32).at[:, :hidden_dim].set(b2.astype(f32))
    # fc3 weight, transposed and sublane-padded to 8 rows (row 0 real, rest zero).
    w3t_p = jnp.zeros((8, hidden_p), bf16).at[0, :hidden_dim].set(w3.astype(bf16)[:, 0])
    b3_p = b3.astype(f32).reshape(1, 1)

    # Weights / biases are VMEM-resident: constant index_map + single buffer
    # (no point double-buffering blocks that never change; on v7x's 64 MiB VMEM
    # this halves the resident-weight footprint).
    def resident(shape):
        return pl.BlockSpec(shape, lambda i: (0, 0), pipeline_mode=pl.Buffered(1))

    # For hidden_dim >~ 3-4K, W2 stops fitting v7x VMEM as a resident block: add a
    # K-reduction grid axis over hidden with an f32 accumulator scratch
    # (init/finalize via pl.when) instead of the resident w2_p block. Not needed
    # at these sizes.

    # Explicit VMEM budget with generation-dependent cap.
    b_bf16, b_f32 = 2, 4
    vmem_needed = (
        2 * tile_b * input_dim * b_bf16                                   # x tiles (2 bufs)
        + 2 * tile_b * b_f32                                              # (1,tile_b) out tiles
        + (input_dim * hidden_p + hidden_p * hidden_p + 8 * hidden_p) * b_bf16  # weights (1 buf)
        + (2 * hidden_p + 1) * b_f32                                      # biases (1 buf)
        + 6 * tile_b * hidden_p * b_f32                                   # intermediates headroom
    )
    vmem_limit = min(max(2 * vmem_needed, 8 * 1024 * 1024), _vmem_cap_bytes())

    out_row = pl.pallas_call(
        _make_kernel(act_dtype),
        out_shape=jax.ShapeDtypeStruct((1, B), jnp.float32),
        grid_spec=pltpu.PrefetchScalarGridSpec(
            num_scalar_prefetch=0,
            grid=grid,
            in_specs=[
                pl.BlockSpec((tile_b, input_dim), lambda i: (i, 0)),  # x tile (bf16)
                resident((input_dim, hidden_p)),                      # w1 (bf16, padded)
                resident((1, hidden_p)),                              # b1 (f32, padded)
                resident((hidden_p, hidden_p)),                       # w2 (bf16, padded)
                resident((1, hidden_p)),                              # b2 (f32, padded)
                resident((8, hidden_p)),                              # w3^T (bf16, padded)
                resident((1, 1)),                                     # b3 (f32)
            ],
            out_specs=pl.BlockSpec((1, tile_b), lambda i: (0, i)),
        ),
        compiler_params=pltpu.CompilerParams(
            dimension_semantics=("parallel",),
            vmem_limit_bytes=int(vmem_limit),
        ),
    )(x_bf, w1_p, b1_p, w2_p, b2_p, w3t_p, b3_p)

    return out_row.reshape(B, 1)


def init_params(key, input_dim, hidden_dim):
    """Deterministic init mimicking nn.Linear's U(-1/sqrt(fan_in), 1/sqrt(fan_in))."""
    ks = jax.random.split(key, 6)

    def linear(kw, kb, fan_in, fan_out):
        bound = 1.0 / jnp.sqrt(fan_in)
        w = jax.random.uniform(kw, (fan_in, fan_out), jnp.float32, -bound, bound)
        b = jax.random.uniform(kb, (1, fan_out), jnp.float32, -bound, bound)
        return w, b

    w1, b1 = linear(ks[0], ks[1], input_dim, hidden_dim)
    w2, b2 = linear(ks[2], ks[3], hidden_dim, hidden_dim)
    w3, b3 = linear(ks[4], ks[5], hidden_dim, 1)
    return (w1, b1, w2, b2, w3, b3)


def reference_forward(x, params, *, act_dtype=jnp.float32):
    """Pure-JAX reference mirroring the kernel's bf16-storage / f32-accum math."""
    w1, b1, w2, b2, w3, b3 = params
    bf16 = jnp.bfloat16
    xb = x.astype(bf16)
    z1 = jnp.dot(xb, w1.astype(bf16), preferred_element_type=jnp.float32) + b1
    h1 = jnp.tanh(z1.astype(act_dtype)).astype(bf16)
    z2 = jnp.dot(h1, w2.astype(bf16), preferred_element_type=jnp.float32) + b2
    h2 = jnp.tanh(z2.astype(act_dtype)).astype(bf16)
    return jnp.dot(h2, w3.astype(bf16), preferred_element_type=jnp.float32) + b3


if __name__ == "__main__":
    key = jax.random.PRNGKey(0)
    k_x, k_p = jax.random.split(key)

    batch = 16
    input_dim = 16
    hidden_dim = 64  # module default

    x = jax.random.normal(k_x, (batch, input_dim), jnp.float32)
    params = init_params(k_p, input_dim, hidden_dim)

    act_dtype = _default_act_dtype()
    # Default tile_b = whole batch -> grid=(1,): at these shapes the kernel is
    # latency-bound, so a single grid step is the fastest configuration.
    out = value_network_forward(x, params, act_dtype=act_dtype)
    out = jax.block_until_ready(out)

    ref = reference_forward(x, params, act_dtype=act_dtype)
    assert out.shape == (batch, 1)
    assert jnp.allclose(out, ref, atol=2e-3, rtol=2e-3), "mismatch vs reference"

    print("KERNEL_OK")
</pallas_src>

<mosaic_0001>
module attributes {stable_mosaic.version = 11 : i64} {
  func.func @kernel(%arg0: i32, %arg1: memref<16x16xbf16, #tpu.memory_space<vmem>>, %arg2: memref<16x128xbf16, #tpu.memory_space<vmem>>, %arg3: memref<1x128xf32, #tpu.memory_space<vmem>>, %arg4: memref<128x128xbf16, #tpu.memory_space<vmem>>, %arg5: memref<1x128xf32, #tpu.memory_space<vmem>>, %arg6: memref<8x128xbf16, #tpu.memory_space<vmem>>, %arg7: memref<1x1xf32, #tpu.memory_space<vmem>>, %arg8: memref<1x16xf32, #tpu.memory_space<vmem>>) attributes {dimension_semantics = [#tpu.dimension_semantics<parallel>], iteration_bounds = array<i64: 1>, scalar_prefetch = 0 : i64, scratch_operands = 0 : i64, tpu.core_type = #tpu.core_type<tc>, window_params = [{transform_indices = @transform_0, window_bounds = array<i64: 16, 16>}, {pipeline_mode = #tpu.pipeline_mode<synchronous>, transform_indices = @transform_1, window_bounds = array<i64: 16, 128>}, {pipeline_mode = #tpu.pipeline_mode<synchronous>, transform_indices = @transform_2, window_bounds = array<i64: 1, 128>}, {pipeline_mode = #tpu.pipeline_mode<synchronous>, transform_indices = @transform_3, window_bounds = array<i64: 128, 128>}, {pipeline_mode = #tpu.pipeline_mode<synchronous>, transform_indices = @transform_4, window_bounds = array<i64: 1, 128>}, {pipeline_mode = #tpu.pipeline_mode<synchronous>, transform_indices = @transform_5, window_bounds = array<i64: 8, 128>}, {pipeline_mode = #tpu.pipeline_mode<synchronous>, transform_indices = @transform_6, window_bounds = array<i64: 1, 1>}, {transform_indices = @transform_7, window_bounds = array<i64: 1, 16>}]} {
    %c0 = arith.constant 0 : index
    %c0_0 = arith.constant 0 : index
    %0 = vector.load %arg1[%c0, %c0_0] : memref<16x16xbf16, #tpu.memory_space<vmem>>, vector<16x16xbf16>
    %c0_1 = arith.constant 0 : index
    %c0_2 = arith.constant 0 : index
    %1 = vector.load %arg2[%c0_1, %c0_2] : memref<16x128xbf16, #tpu.memory_space<vmem>>, vector<16x128xbf16>
    %cst = arith.constant dense<0.000000e+00> : vector<16x128xf32>
    %2 = tpu.matmul %0, %1, %cst {dimension_numbers = #tpu.dot_dimension_numbers<[1], [0], [0], [1], [0, 0, 1, 1], [], []>} : vector<16x16xbf16>, vector<16x128xbf16>, vector<16x128xf32> -> vector<16x128xf32>
    %c0_3 = arith.constant 0 : index
    %c0_4 = arith.constant 0 : index
    %3 = vector.load %arg3[%c0_3, %c0_4] : memref<1x128xf32, #tpu.memory_space<vmem>>, vector<1x128xf32>
    %4 = vector.broadcast %3 : vector<1x128xf32> to vector<16x128xf32>
    %5 = arith.addf %2, %4 : vector<16x128xf32>
    %6 = arith.truncf %5 : vector<16x128xf32> to vector<16x128xbf16>
    %7 = math.tanh %6 : vector<16x128xbf16>
    %c0_5 = arith.constant 0 : index
    %c0_6 = arith.constant 0 : index
    %8 = vector.load %arg4[%c0_5, %c0_6] : memref<128x128xbf16, #tpu.memory_space<vmem>>, vector<128x128xbf16>
    %cst_7 = arith.constant dense<0.000000e+00> : vector<16x128xf32>
    %9 = tpu.matmul %7, %8, %cst_7 {dimension_numbers = #tpu.dot_dimension_numbers<[1], [0], [0], [1], [0, 0, 1, 1], [], []>} : vector<16x128xbf16>, vector<128x128xbf16>, vector<16x128xf32> -> vector<16x128xf32>
    %c0_8 = arith.constant 0 : index
    %c0_9 = arith.constant 0 : index
    %10 = vector.load %arg5[%c0_8, %c0_9] : memref<1x128xf32, #tpu.memory_space<vmem>>, vector<1x128xf32>
    %11 = vector.broadcast %10 : vector<1x128xf32> to vector<16x128xf32>
    %12 = arith.addf %9, %11 : vector<16x128xf32>
    %13 = arith.truncf %12 : vector<16x128xf32> to vector<16x128xbf16>
    %14 = math.tanh %13 : vector<16x128xbf16>
    %c0_10 = arith.constant 0 : index
    %c0_11 = arith.constant 0 : index
    %15 = vector.load %arg6[%c0_10, %c0_11] : memref<8x128xbf16, #tpu.memory_space<vmem>>, vector<8x128xbf16>
    %cst_12 = arith.constant dense<0.000000e+00> : vector<8x16xf32>
    %16 = tpu.matmul %15, %14, %cst_12 {dimension_numbers = #tpu.dot_dimension_numbers<[1], [1], [0], [0], [0, 0, 1, 0], [], []>} : vector<8x128xbf16>, vector<16x128xbf16>, vector<8x16xf32> -> vector<8x16xf32>
    %17 = vector.extract_strided_slice %16 {offsets = [0, 0], sizes = [1, 16], strides = [1, 1]} : vector<8x16xf32> to vector<1x16xf32>
    %c0_13 = arith.constant 0 : index
    %c0_14 = arith.constant 0 : index
    %18 = vector.load %arg7[%c0_13, %c0_14] : memref<1x1xf32, #tpu.memory_space<vmem>>, vector<1x1xf32>
    %19 = vector.broadcast %18 : vector<1x1xf32> to vector<1x16xf32>
    %20 = arith.addf %17, %19 : vector<1x16xf32>
    %c0_15 = arith.constant 0 : index
    %c0_16 = arith.constant 0 : index
    %21 = vector.load %arg8[%c0_15, %c0_16] : memref<1x16xf32, #tpu.memory_space<vmem>>, vector<1x16xf32>
    tpu.vector_store %arg8[%c0_15, %c0_16], %20 {strides = array<i32>} : memref<1x16xf32, #tpu.memory_space<vmem>>, vector<1x16xf32>,
    return
  }
  func.func @transform_0(%arg0: i32) -> (i32, i32) {
    %c0_i32 = arith.constant 0 : i32
    %c0_i32_0 = arith.constant 0 : i32
    return %arg0, %c0_i32 : i32, i32
  }
  func.func @transform_1(%arg0: i32) -> (i32, i32) {
    %c0_i32 = arith.constant 0 : i32
    %c0_i32_0 = arith.constant 0 : i32
    %c0_i32_1 = arith.constant 0 : i32
    return %c0_i32, %c0_i32_0 : i32, i32
  }
  func.func @transform_2(%arg0: i32) -> (i32, i32) {
    %c0_i32 = arith.constant 0 : i32
    %c0_i32_0 = arith.constant 0 : i32
    %c0_i32_1 = arith.constant 0 : i32
    return %c0_i32, %c0_i32_0 : i32, i32
  }
  func.func @transform_3(%arg0: i32) -> (i32, i32) {
    %c0_i32 = arith.constant 0 : i32
    %c0_i32_0 = arith.constant 0 : i32
    %c0_i32_1 = arith.constant 0 : i32
    return %c0_i32, %c0_i32_0 : i32, i32
  }
  func.func @transform_4(%arg0: i32) -> (i32, i32) {
    %c0_i32 = arith.constant 0 : i32
    %c0_i32_0 = arith.constant 0 : i32
    %c0_i32_1 = arith.constant 0 : i32
    return %c0_i32, %c0_i32_0 : i32, i32
  }
  func.func @transform_5(%arg0: i32) -> (i32, i32) {
    %c0_i32 = arith.constant 0 : i32
    %c0_i32_0 = arith.constant 0 : i32
    %c0_i32_1 = arith.constant 0 : i32
    return %c0_i32, %c0_i32_0 : i32, i32
  }
  func.func @transform_6(%arg0: i32) -> (i32, i32) {
    %c0_i32 = arith.constant 0 : i32
    %c0_i32_0 = arith.constant 0 : i32
    %c0_i32_1 = arith.constant 0 : i32
    return %c0_i32, %c0_i32_0 : i32, i32
  }
  func.func @transform_7(%arg0: i32) -> (i32, i32) {
    %c0_i32 = arith.constant 0 : i32
    %c0_i32_0 = arith.constant 0 : i32
    return %c0_i32, %arg0 : i32, i32
  }
}

</mosaic_0001>

<bundles_post_ra>
// kernel: tpu_custom_call.1
= control target key start
LH: loop header
LB: loop body
LE: loop exit
PB: predicated region body
PF: predicated region fallthrough
CT: control target
= control target key end

     0   :  { %s625_s0 = inlined_call_operand.hbm [shape: bf16[16,16], index: 0, kind: input, shape index: {}]   ;;  %s626_s1 = inlined_call_operand.hbm [shape: bf16[16,128], index: 1, kind: input, shape index: {}]   ;;  %s627_s2 = inlined_call_operand.vmem [shape: f32[1,128], index: 2, kind: input, shape index: {}]   ;;  %s628_s3 = inlined_call_operand.hbm [shape: bf16[128,128], index: 3, kind: input, shape index: {}]   ;;  %s629_s4 = inlined_call_operand.vmem [shape: f32[1,128], index: 4, kind: input, shape index: {}]   ;;  %s630_s5 = inlined_call_operand.vmem [shape: bf16[8,128], index: 5, kind: input, shape index: {}]   ;;  %s631_s6 = inlined_call_operand.<no memory space> [shape: f32[1,1], index: 6, kind: input, shape index: {}]   ;;  %s632_s7 = inlined_call_operand.hbm [shape: f32[1,16], index: 7, kind: output, shape index: {}]  }
   0x1   :  { %v12_v0 = vstv %s631_s6 }
   0x2   :  { %13 = vst [vmem:[#allocation2] sm:$0x1] %v12_v0 }
   0x3   :  { %14 = vsyncpa [#allocation4], 0 }
   0x4   :  { %15 = vsyncpa [#allocation7], 0 }
   0x5   :  { %16 = vsyncpa [#allocation5], 0  ;;  %s500_s26 = smov [#allocation6]   ;;  %s501_s28 = smov [#allocation3]  }
   0x6   :  { %s34_s27 = sshll.u32 %s500_s26, 4  ;;  %s22_s29 = sshll.u32 %s501_s28, 4  ;;  %s35_s27 = int_to_ptr.vmem [resolvable:$true] %s34_s27  ;;  %s552_s29 = int_to_ptr.vmem [resolvable:$true] %s22_s29 }
   0x7   :  { %s406_s9 = scalar_lea.hbm %s626_s1, 128 }
   0x8   :  { %p407_p0 = scmp.ne.s32.totalorder %s626_s1, %s406_s9  ;;  %p410_p1 = scmp.lt.u32.totalorder %s406_s9, %s626_s1 }
   0xa   :  { %p412_p2 = pnand %p410_p1, %p407_p0 }
   0xc   :  { %415 = shalt.err (!%p412_p2)
}
   0xd   :  { %s416_s13 = scalar_lea.vmem %s35_s27, 128  ;;  %p421_p4 = scmp.lt.s32.totalorder %s35_s27, %s35_s27 }
   0xe   :  { %p417_p3 = scmp.ne.s32.totalorder %s35_s27, %s416_s13  ;;  %p422_p5 = scmp.lt.s32.totalorder %s416_s13, %s416_s13 }
  0x10   :  { %p423_p6 = por %p422_p5, %p421_p4 }
  0x12   :  { %p424_p7 = pnand %p423_p6, %p417_p3 }
  0x14   :  { %427 = shalt.err (!%p424_p7)
}
  0x15   :  { %s502_s14 = smov 64   ;;  %s503_s15 = smov 4  }
  0x16   :  { %40 = dma.hbm_to_vmem [thread:$0]  %s626_s1, 128, %s35_s27, [#allocation7], %s502_s14, %s502_s14, %s503_s15  }
  0x17   :  { %s428_s20 = scalar_lea.hbm %s625_s0, 128 }
  0x18   :  { %p429_p8 = scmp.ne.s32.totalorder %s625_s0, %s428_s20  ;;  %p432_p9 = scmp.lt.u32.totalorder %s428_s20, %s625_s0 }
  0x1a   :  { %p434_p10 = pnand %p432_p9, %p429_p8 }
  0x1c   :  { %437 = shalt.err (!%p434_p10)
}
  0x1d   :  { %s438_s25 = scalar_lea.vmem %s552_s29, 128  ;;  %p443_p12 = scmp.lt.s32.totalorder %s552_s29, %s552_s29 }
  0x1e   :  { %p439_p11 = scmp.ne.s32.totalorder %s552_s29, %s438_s25  ;;  %p444_p13 = scmp.lt.s32.totalorder %s438_s25, %s438_s25 }
  0x20   :  { %p445_p0 = por %p444_p13, %p443_p12 }
  0x22   :  { %p446_p1 = pnand %p445_p0, %p439_p11 }
  0x24   :  { %449 = shalt.err (!%p446_p1)
}
  0x25   :  { %28 = dma.hbm_to_vmem [thread:$0]  %s625_s0, 128, %s552_s29, [#allocation4], %s502_s14, %s502_s14, %s503_s15  }
  0x26   :  { %s504_s27 = smov [#allocation8]   ;;  %s450_s9 = scalar_lea.hbm %s628_s3, 1024 }
  0x27   :  { %s48_s28 = sshll.u32 %s504_s27, 4  ;;  %p451_p2 = scmp.ne.s32.totalorder %s628_s3, %s450_s9  ;;  %s49_s28 = int_to_ptr.vmem [resolvable:$true] %s48_s28 }
  0x28   :  { %p454_p3 = scmp.lt.u32.totalorder %s450_s9, %s628_s3 }
  0x2a   :  { %p456_p4 = pnand %p454_p3, %p451_p2 }
  0x2c   :  { %459 = shalt.err (!%p456_p4)
}
  0x2d   :  { %s460_s13 = scalar_lea.vmem %s49_s28, 1024  ;;  %p465_p6 = scmp.lt.s32.totalorder %s49_s28, %s49_s28 }
  0x2e   :  { %p461_p5 = scmp.ne.s32.totalorder %s49_s28, %s460_s13  ;;  %p466_p7 = scmp.lt.s32.totalorder %s460_s13, %s460_s13 }
  0x30   :  { %p467_p8 = por %p466_p7, %p465_p6 }
  0x32   :  { %p468_p9 = pnand %p467_p8, %p461_p5 }
  0x34   :  { %471 = shalt.err (!%p468_p9)
}
  0x35   :  { %54 = dma.hbm_to_vmem [thread:$0]  %s628_s3, 1024, %s49_s28, [#allocation7], %s502_s14, %s502_s14, %s503_s15  }
  0x36   :  { %494 = dma.done.wait [#allocation4], 128  }
  0x37   :  { %495 = vsyncadd [#allocation4], 4294967168 }
  0x38   :  { %496 = dma.done.wait [#allocation7], 1152  }
  0x39   :  { %497 = vsyncadd [#allocation7], 4294966144  ;;  %v505_v1 = vmov 0.0   ;;  %vm506_vm0 = vmmov 0   ;;  %v392_v2 = vld [vmem:[#allocation6] sm:$0xff]   ;;  %v393_v3 = vld [vmem:[#allocation3] sm:$0xff]   ;;  %v301_v33 = vlaneseq }
  0x3a   :  { %350 = vmatprep.subr.bf16.mxu0 %v505_v1  ;;  %352 = vmatprep.mubr.msk.bf16.mxu0 %vm506_vm0, %v505_v1  ;;  %vm93_vm1 = vcmask 130048   ;;  %v394_v4 = vld [vmem:[#allocation8] sm:$0xff]   ;;  %v395_v5 = vld [vmem:[#allocation8 + $0x8] sm:$0xff]   ;;  %v396_v6 = vld [vmem:[#allocation8 + $0x10] sm:$0xff]   ;;  %v507_v22 = vmov 0   ;;  %vm306_vm2 = vcmask 122880  }
  0x3b   :  { %356 = vmatprep.subr.bf16.mxu1 %v505_v1  ;;  %372 = vmatprep.mubr.msk.bf16.mxu1 %vm506_vm0, %v505_v1  ;;  %v397_v7 = vld [vmem:[#allocation8 + $0x18] sm:$0xff]   ;;  %v398_v8 = vld [vmem:[#allocation8 + $0x20] sm:$0xff]   ;;  %v399_v9 = vld [vmem:[#allocation8 + $0x28] sm:$0xff]   ;;  %v302_v34 = vshrl.u32 %v301_v33, 7 }
  0x3c   :  { %351 = vmatpush3.bf16.msra.mxu0 %v392_v2  ;;  %357 = vmatpush3.bf16.msra.mxu1 %v394_v4  ;;  %v400_v10 = vld [vmem:[#allocation8 + $0x30] sm:$0xff]   ;;  %v401_v11 = vld [vmem:[#allocation8 + $0x38] sm:$0xff]   ;;  %v324_v12 = vld [vmem:[%s627_s2] ss:$0 sm:$0xff] }
  0x3d   :  { %376 = vmatprep.subr.bf16.mxu0 %v505_v1  ;;  %358 = vmatprep.subr.bf16.mxu1 %v505_v1  ;;  %v295_v21 = vld [vmem:[#allocation2] sm:$0x1]  ;;  %v303_v35 = vsub.s32 0, %v302_v34 }
  0x3e   :  { %391 = vset.pattern.permute.xlu0 %v507_v22  ;;  %v328_v23 = vld [vmem:[%s629_s4] ss:$0 sm:$0xff]  ;;  %s508_s4 = smov [#allocation9]  }
  0x3f   :  { %353 = vmatmul.mubr.msk.bf16.vlgmr.msra.gmra.mrb[0].mxu0 %vm93_vm1, %v393_v3  ;;  %298 = vperm.xlu0 %391, %v295_v21   ;;  %v254_v32 = vld [vmem:[%s630_s5] sm:$0xf]  ;;  %s314_s18 = sshll.u32 %s508_s4, 4  ;;  %s315_s18 = int_to_ptr.vmem [resolvable:$true] %s314_s18 }
  0x40   :  { %378 = vmatprep.mubr.msk.bf16.mxu0 %vm506_vm0, %v505_v1  ;;  %359 = vmatpush3.bf16.msra.mxu1 %v395_v5  ;;  %s472_s19 = scalar_lea.vmem %s315_s18, 16  ;;  %s476_s20 = scalar_lea.vmem %s315_s18, 32 }
  0x41   :  { %360 = vmatprep.subr.bf16.mxu1 %v505_v1  ;;  %p473_p10 = scmp.ne.s32.totalorder %s315_s18, %s472_s19  ;;  %p477_p11 = scmp.lt.s32.totalorder %s315_s18, %s315_s18 }
  0x42   :  { %p478_p12 = scmp.lt.s32.totalorder %s476_s20, %s472_s19 }
  0x44   :  { %361 = vmatpush3.bf16.msra.mxu1 %v396_v6  ;;  %p479_p13 = por %p478_p12, %p477_p11 }
  0x45   :  { %362 = vmatprep.subr.bf16.mxu1 %v505_v1 }
  0x46   :  { %p480_p0 = pnand %p479_p13, %p473_p10 }
  0x48   :  { %363 = vmatpush3.bf16.msra.mxu1 %v397_v7 }
  0x49   :  { %364 = vmatprep.subr.bf16.mxu1 %v505_v1 }
  0x4c   :  { %365 = vmatpush3.bf16.msra.mxu1 %v398_v8 }
  0x4d   :  { %366 = vmatprep.subr.bf16.mxu1 %v505_v1 }
  0x50   :  { %367 = vmatpush3.bf16.msra.mxu1 %v399_v9 }
  0x51   :  { %368 = vmatprep.subr.bf16.mxu1 %v505_v1 }
  0x54   :  { %369 = vmatpush3.bf16.msra.mxu1 %v400_v10 }
  0x55   :  { %370 = vmatprep.subr.bf16.mxu1 %v505_v1 }
  0x58   :  { %371 = vmatpush3.bf16.msra.mxu1 %v401_v11 }
  0xbe   :  { %v299_v36 = vpop.permute.xlu0 %298 }
  0xbf   :  { %v304_v37 = vrot.slane %v299_v36, %v303_v35 }
 0x112   :  { %v131_v13 = vpop.f32.mrb[0].mxu0 }
 0x113   :  { %v354_v14 = vpop.f32.mrb[1].mxu0  ;;  %v132_v16 = vadd.f32 %v324_v12, %v131_v13 }
 0x114   :  { %v134_v15 = vpop.f32.mrb[2].mxu0 }
 0x115   :  { %v135_v17 = vadd.f32 %v324_v12, %v134_v15  ;;  %v355_v18 = vpop.f32.mrb[3].mxu0 }
 0x117   :  { %v138_v19 = vpack.c.bf16 %v135_v17, %v132_v16 }
 0x119   :  { %402 = vtanh.bf16 %v138_v19 }
 0x124   :  { %v403_v20 = vpop.eup %402 }
 0x125   :  { %373 = vmatmul.mubr.bf16.vlgmr.msra.gmra.mrb[0].mxu1 %v403_v20 }
 0x1f8   :  { %v245_v24 = vpop.f32.mrb[0].mxu1 }
 0x1f9   :  { %v374_v25 = vpop.f32.mrb[1].mxu1  ;;  %v246_v27 = vadd.f32 %v328_v23, %v245_v24 }
 0x1fa   :  { %v248_v26 = vpop.f32.mrb[2].mxu1 }
 0x1fb   :  { %v249_v28 = vadd.f32 %v328_v23, %v248_v26  ;;  %v375_v29 = vpop.f32.mrb[3].mxu1 }
 0x1fd   :  { %v252_v30 = vpack.c.bf16 %v249_v28, %v246_v27 }
 0x1ff   :  { %404 = vtanh.bf16 %v252_v30 }
 0x20a   :  { %v405_v31 = vpop.eup %404 }
 0x20b   :  { %377 = vmatpush3.bf16.xpose.msra.mxu0 %v405_v31 }
 0x212   :  { %379 = vmatmul.mubr.bf16.vlgmr.msra.gmra.mrb[4].mxu0 %v254_v32 }
 0x2e5   :  { %v289_v38 = vpop.f32.mrb[4].mxu0 }
 0x2e6   :  { %v305_v39 = vadd.f32 %v304_v37, %v289_v38  ;;  %v380_v40 = vpop.f32.mrb[5].mxu0 }
 0x2e7   :  { %v292_v41 = vpop.f32.mrb[6].mxu0 }
 0x2e8   :  { %v381_v42 = vpop.f32.mrb[7].mxu0  ;;  %307 = vst.msk [vmem:[#allocation9] sm:$0x1] %vm306_vm2, %v305_v39 }
 0x2e9   :  { %483 = shalt.err (!%p480_p0)
}
 0x2ea   :  { %s484_s22 = scalar_lea.hbm %s632_s7, 16 }
 0x2eb   :  { %p485_p1 = scmp.ne.s32.totalorder %s632_s7, %s484_s22  ;;  %p488_p2 = scmp.lt.u32.totalorder %s484_s22, %s632_s7 }
 0x2ed   :  { %p490_p3 = pnand %p488_p2, %p485_p1 }
 0x2ef   :  { %493 = shalt.err (!%p490_p3)
}
 0x2f0   :  { %317 = dma.vmem_to_hbm [thread:$0]  %s315_s18, 16, %s632_s7, [#allocation5]  }
 0x2f1   :  { %498 = dma.done.wait [#allocation5], 16  }
 0x2f2   :  { %499 = vsyncadd [#allocation5], 4294967280 }
 0x2f3   :  { %321 = vsyncpa [#allocation4], 1 }
 0x2f4   :  { %322 = vsyncpa [#allocation7], 1 }
 0x2f5   :  { %323 = vsyncpa [#allocation5], 1 }

</bundles_post_ra>
